<compile_context>
chip_gen: v7x
topology: tpu7x:2x2x1
jax: 0.10.0
libtpu: 0.0.40
codegen_flags: <defaults>
</compile_context>

<pallas_src>
import functools
import math

import jax
import jax.numpy as jnp
import numpy as np
from jax.experimental import pallas as pl
from jax.experimental.pallas import tpu as pltpu


def _muview_attention_kernel(x_ref, wqk_ref, bqk_ref, a_ref, ws_ref, bsl_ref, o_ref, *,
                             num):
    """One batch tile (BT batch elements x 3 views) per grid step.

    x_ref   : (BT*3*num, D)  matmul dtype; per batch element the 3 views stacked row-wise
                             (rows [0:num]=risk, [num:2num]=road, [2num:3num]=poi)
    wqk_ref : (D, 2*dm)      fused [Wq * 1/sqrt(dm) | Wk], pre-transposed, matmul dtype
    bqk_ref : (1, 2*dm)      fused [bq * 1/sqrt(dm) | bk], f32
    a_ref   : (3, D)         per-view mixing coefficient a_g broadcast along D, f32
    ws_ref  : (dm, dm)       S_linear weight, pre-transposed, matmul dtype
    bsl_ref : (1, dm)        f32
    o_ref   : (BT*num, dm)   f32
    """
    M, D = x_ref.shape            # M = BT * 3 * num
    dm = ws_ref.shape[1]
    G = M // num                  # BT * 3 attention groups (one per batch element & view)
    BT = G // 3

    x = x_ref[...]                # matmul dtype (bf16 or f32)

    # Fused Q|K projection: one big-M MXU matmul with f32 accumulation. The 1/sqrt(d_model)
    # attention scale is already folded into Wq / bq, so no per-score multiply is needed.
    qk = jnp.dot(x, wqk_ref[...], preferred_element_type=jnp.float32) + bqk_ref[...]
    q = qk[:, :dm].reshape(G, num, dm)     # static lane-offset slices of the fused result
    k = qk[:, dm:].reshape(G, num, dm)
    v = x.reshape(G, num, D)               # leading-dim split only (no lane relayout)

    # Batched attention over all (batch element, view) groups at once: two batched
    # dot_generals and one softmax pass instead of a BT*3-way unrolled loop of tiny dots.
    s = jnp.einsum("gqd,gkd->gqk", q, k,
                   preferred_element_type=jnp.float32)                 # (G, num, num)
    e = jnp.exp(s - jnp.max(s, axis=-1, keepdims=True))
    p = e * pl.reciprocal(jnp.sum(e, axis=-1, keepdims=True), approx=True)   # EUP recip
    attn = jnp.einsum("gqk,gkd->gqd", p.astype(x.dtype), v,
                      preferred_element_type=jnp.float32)               # (G, num, D)

    # Per-view residual mix + sum over the 3 views, fully vectorized (elementwise in f32).
    attn4 = attn.reshape(BT, 3, num, D)
    x4 = v.astype(jnp.float32).reshape(BT, 3, num, D)
    a = a_ref[...][:, None, :]                          # (3,1,D) -> bcast to (BT,3,num,D)
    mixed = jnp.sum(a * attn4 + (1.0 - a) * x4, axis=1)                 # (BT, num, D)

    # Fused S_linear over the whole batch tile; 2-D store (no in-kernel output reshape).
    out = jnp.dot(mixed.reshape(BT * num, D).astype(x.dtype), ws_ref[...],
                  preferred_element_type=jnp.float32) + bsl_ref[...]
    o_ref[...] = out.astype(o_ref.dtype)


def _vmem_budget_bytes():
    """Per-generation VMEM budget: 128 MiB on v5e/v6e, 64 MiB per TensorCore on v7x.
    Query the device when possible; otherwise assume the smallest (v7x) so the tile
    choice is safe on every generation. Leave headroom for compiler scratch."""
    try:
        cap = int(pltpu.get_tpu_info().vmem_capacity_bytes)
    except Exception:
        cap = 64 * 1024 * 1024
    return max(int(cap * 0.75), 16 * 1024 * 1024)


def _pick_batch_tile(bs, num, D, dm, mm_bytes, vmem_budget):
    """Largest divisor of bs whose per-step footprint fits the VMEM budget; if the whole
    batch fits in one step, split to nb>=2 only when the fused-matmul M stays >=256 rows
    (so v7x megacore sharding does not come at the cost of an under-filled MXU M dim)."""
    def step_bytes(bt):
        m = bt * 3 * num
        x_blk = m * D * mm_bytes
        out_blk = bt * num * dm * 4
        weights = (D * 2 * dm + dm * dm) * mm_bytes + (3 * dm + 3 * D) * 4
        # rough in-kernel f32 intermediates: qk, scores, attn, mixed
        inter = m * 2 * dm * 4 + bt * 3 * num * num * 4 + m * D * 4 + bt * num * D * 4
        return 2 * (x_blk + out_blk) + 2 * weights + inter   # blocks double-buffered

    def sublane_ok(d):
        # keep non-full blocks sublane-tile friendly (16 rows covers bf16 packing)
        return d == bs or ((d * 3 * num) % 16 == 0 and (d * num) % 8 == 0)

    divisors = [d for d in range(1, bs + 1) if bs % d == 0]
    ok = [d for d in divisors if step_bytes(d) <= vmem_budget and sublane_ok(d)]
    bt = max(ok) if ok else 1
    if bt == bs:
        for d in sorted(divisors, reverse=True):
            if d < bs and d * 3 * num >= 256 and step_bytes(d) <= vmem_budget \
                    and sublane_ok(d):
                bt = d
                break
    return bt


def muview_attention_pallas(risk_in, road_in, poi_in, params, *, batch_tile=None,
                            matmul_dtype=jnp.bfloat16):
    """risk_in/road_in/poi_in: (bs, num, GCN_size) float32. Returns (bs, num, d_model)."""
    bs, num, D = road_in.shape
    wq, bq = params["wq"], params["bq"]
    wk, bk = params["wk"], params["bk"]
    ws, bsl = params["ws"], params["bs"]
    a = params["a"]                                    # (3,) -> a1, a2, a3
    dm = wq.shape[0]
    assert D == dm, "S_linear(d_model, d_model) requires GCN_size == d_model (as in PyTorch)"

    mm_bytes = int(np.dtype(matmul_dtype).itemsize)
    vmem_budget = _vmem_budget_bytes()
    if batch_tile is None:
        batch_tile = _pick_batch_tile(bs, num, D, dm, mm_bytes, vmem_budget)
    assert bs % batch_tile == 0
    nb = bs // batch_tile

    # (bs, 3, num, D) -> (bs*3*num, D): per batch element, the 3 views stacked row-wise.
    # Flattened in the wrapper so the kernel input block stays 2-D (no in-kernel relayout
    # of the lane-padded block).
    x = jnp.stack([risk_in, road_in, poi_in], axis=1).reshape(bs * 3 * num, D)
    x = x.astype(matmul_dtype)

    scale = 1.0 / math.sqrt(dm)        # attention() is called with d_k = d_model
    # Fused [Wq*scale | Wk] so Q and K come out of a single MXU matmul; baking the scale
    # into Wq/bq removes all in-kernel score scaling.
    wqk = jnp.concatenate([wq.T * scale, wk.T], axis=1).astype(matmul_dtype)  # (D, 2*dm)
    bqk = jnp.concatenate([bq * scale, bk]).reshape(1, 2 * dm).astype(jnp.float32)
    ws_t = ws.T.astype(matmul_dtype)                                          # (dm, dm)
    bs2 = bsl.reshape(1, dm).astype(jnp.float32)
    a_b = jnp.broadcast_to(a.reshape(3, 1).astype(jnp.float32), (3, D))

    kernel = functools.partial(_muview_attention_kernel, num=num)
    full = lambda shape: pl.BlockSpec(shape, lambda i: (0,) * len(shape))

    out = pl.pallas_call(
        kernel,
        out_shape=jax.ShapeDtypeStruct((bs * num, dm), jnp.float32),
        grid=(nb,),
        in_specs=[
            pl.BlockSpec((batch_tile * 3 * num, D), lambda i: (i, 0)),   # x (2-D)
            full((D, 2 * dm)), full((1, 2 * dm)),                        # fused Wqk, bqk
            full((3, D)),                                                # a1..a3 (bcast)
            full((dm, dm)), full((1, dm)),                               # Ws, bs
        ],
        out_specs=pl.BlockSpec((batch_tile * num, dm), lambda i: (i, 0)),
        compiler_params=pltpu.CompilerParams(
            dimension_semantics=("parallel",),
            vmem_limit_bytes=vmem_budget),
    )(x, wqk, bqk, a_b, ws_t, bs2)
    return out.reshape(bs, num, dm)


def init_params(key, GCN_size, d_model):
    """Deterministic init matching Muview_Attention(GCN_size, d_model) shapes."""
    ks = jax.random.split(key, 7)
    lim_qk = 1.0 / math.sqrt(GCN_size)
    lim_s = 1.0 / math.sqrt(d_model)
    wq = jax.random.uniform(ks[0], (d_model, GCN_size), jnp.float32, -lim_qk, lim_qk)
    bq = jax.random.uniform(ks[1], (d_model,), jnp.float32, -lim_qk, lim_qk)
    wk = jax.random.uniform(ks[2], (d_model, GCN_size), jnp.float32, -lim_qk, lim_qk)
    bk = jax.random.uniform(ks[3], (d_model,), jnp.float32, -lim_qk, lim_qk)
    ws = jax.random.uniform(ks[4], (d_model, d_model), jnp.float32, -lim_s, lim_s)
    bsl = jax.random.uniform(ks[5], (d_model,), jnp.float32, -lim_s, lim_s)
    a = jax.random.uniform(ks[6], (3,), jnp.float32, 0.0, 1.0)  # a1, a2, a3
    return dict(wq=wq, bq=bq, wk=wk, bk=bk, ws=ws, bs=bsl, a=a)


def reference(risk_in, road_in, poi_in, params):
    """Pure-JAX transcription of Muview_Attention.forward (including the redundant
    3-iteration loop and /3 averaging of the original PyTorch code)."""
    bs, num, D = road_in.shape
    wq, bq = params["wq"], params["bq"]
    wk, bk = params["wk"], params["bk"]
    ws, bsl = params["ws"], params["bs"]
    a1, a2, a3 = params["a"][0], params["a"][1], params["a"][2]
    d_model = wq.shape[0]

    v = jnp.concatenate([risk_in, road_in, poi_in], axis=0).reshape(3, -1, num, D)
    outputs = []
    for _ in range(3):
        k = v @ wk.T + bk
        q = v @ wq.T + bq
        scores = jnp.matmul(q, jnp.swapaxes(k, -2, -1)) / math.sqrt(d_model)
        scores = jax.nn.softmax(scores, axis=-1)
        outputs.append(jnp.matmul(scores, v))
    risk_out = (outputs[0][0] + outputs[1][0] + outputs[2][0]) / 3
    road_out = (outputs[0][1] + outputs[1][1] + outputs[2][1]) / 3
    poi_out = (outputs[0][2] + outputs[1][2] + outputs[2][2]) / 3
    risk = a1 * risk_out + (1 - a1) * risk_in
    road = a2 * road_out + (1 - a2) * road_in
    poi = a3 * poi_out + (1 - a3) * poi_in
    return (risk + road + poi) @ ws.T + bsl


if __name__ == "__main__":
    bs, num = 2, 8
    GCN_size = d_model = 32   # S_linear requires GCN_size == d_model, as in the PyTorch code

    key = jax.random.PRNGKey(0)
    k1, k2, k3, kp = jax.random.split(key, 4)
    risk = jax.random.normal(k1, (bs, num, GCN_size), jnp.float32)
    road = jax.random.normal(k2, (bs, num, GCN_size), jnp.float32)
    poi = jax.random.normal(k3, (bs, num, GCN_size), jnp.float32)

    params = init_params(kp, GCN_size, d_model)
    ref = jax.block_until_ready(reference(risk, road, poi, params))

    # f32 MXU-operand path: tight check against the pure-JAX reference
    # (tolerance allows for the EUP approximate reciprocal in the softmax).
    out_f32 = jax.block_until_ready(
        muview_attention_pallas(risk, road, poi, params, matmul_dtype=jnp.float32))
    np.testing.assert_allclose(np.asarray(out_f32), np.asarray(ref), rtol=5e-3, atol=5e-3)

    # Default bf16 MXU-operand path (f32 accumulation, f32 elementwise math): looser
    # tolerance to cover bf16 operand rounding.
    out_bf16 = jax.block_until_ready(muview_attention_pallas(risk, road, poi, params))
    np.testing.assert_allclose(np.asarray(out_bf16), np.asarray(ref), rtol=3e-2, atol=3e-2)

    print("KERNEL_OK")
</pallas_src>

<mosaic_0001>
module attributes {stable_mosaic.version = 11 : i64} {
  func.func @_muview_attention_kernel(%arg0: i32, %arg1: memref<48x32xf32, #tpu.memory_space<vmem>>, %arg2: memref<32x64xf32, #tpu.memory_space<vmem>>, %arg3: memref<1x64xf32, #tpu.memory_space<vmem>>, %arg4: memref<3x32xf32, #tpu.memory_space<vmem>>, %arg5: memref<32x32xf32, #tpu.memory_space<vmem>>, %arg6: memref<1x32xf32, #tpu.memory_space<vmem>>, %arg7: memref<16x32xf32, #tpu.memory_space<vmem>>) attributes {dimension_semantics = [#tpu.dimension_semantics<parallel>], iteration_bounds = array<i64: 1>, scalar_prefetch = 0 : i64, scratch_operands = 0 : i64, tpu.core_type = #tpu.core_type<tc>, window_params = [{transform_indices = @transform_0, window_bounds = array<i64: 48, 32>}, {pipeline_mode = #tpu.pipeline_mode<synchronous>, transform_indices = @transform_1, window_bounds = array<i64: 32, 64>}, {pipeline_mode = #tpu.pipeline_mode<synchronous>, transform_indices = @transform_2, window_bounds = array<i64: 1, 64>}, {pipeline_mode = #tpu.pipeline_mode<synchronous>, transform_indices = @transform_3, window_bounds = array<i64: 3, 32>}, {pipeline_mode = #tpu.pipeline_mode<synchronous>, transform_indices = @transform_4, window_bounds = array<i64: 32, 32>}, {pipeline_mode = #tpu.pipeline_mode<synchronous>, transform_indices = @transform_5, window_bounds = array<i64: 1, 32>}, {transform_indices = @transform_6, window_bounds = array<i64: 16, 32>}]} {
    %c0 = arith.constant 0 : index
    %c0_0 = arith.constant 0 : index
    %0 = vector.load %arg1[%c0, %c0_0] : memref<48x32xf32, #tpu.memory_space<vmem>>, vector<48x32xf32>
    %c0_1 = arith.constant 0 : index
    %c0_2 = arith.constant 0 : index
    %1 = vector.load %arg2[%c0_1, %c0_2] : memref<32x64xf32, #tpu.memory_space<vmem>>, vector<32x64xf32>
    %cst = arith.constant dense<0.000000e+00> : vector<48x64xf32>
    %2 = tpu.matmul %0, %1, %cst {dimension_numbers = #tpu.dot_dimension_numbers<[1], [0], [0], [1], [0, 0, 1, 1], [], []>} : vector<48x32xf32>, vector<32x64xf32>, vector<48x64xf32> -> vector<48x64xf32>
    %c0_3 = arith.constant 0 : index
    %c0_4 = arith.constant 0 : index
    %3 = vector.load %arg3[%c0_3, %c0_4] : memref<1x64xf32, #tpu.memory_space<vmem>>, vector<1x64xf32>
    %4 = vector.broadcast %3 : vector<1x64xf32> to vector<48x64xf32>
    %5 = arith.addf %2, %4 : vector<48x64xf32>
    %6 = vector.extract_strided_slice %5 {offsets = [0, 0], sizes = [48, 32], strides = [1, 1]} : vector<48x64xf32> to vector<48x32xf32>
    %7 = vector.shape_cast %6 : vector<48x32xf32> to vector<6x8x32xf32>
    %8 = vector.extract_strided_slice %5 {offsets = [0, 32], sizes = [48, 32], strides = [1, 1]} : vector<48x64xf32> to vector<48x32xf32>
    %9 = vector.shape_cast %8 : vector<48x32xf32> to vector<6x8x32xf32>
    %10 = vector.shape_cast %0 : vector<48x32xf32> to vector<6x8x32xf32>
    "tpu.trace_start"() <{level = 10 : i32, message = "gqd,gkd->gqk"}> : () -> ()
    %cst_5 = arith.constant dense<0.000000e+00> : vector<6x8x8xf32>
    %11 = tpu.matmul %7, %9, %cst_5 {dimension_numbers = #tpu.dot_dimension_numbers<[2], [2], [1], [1], [0, 0, 0, 1, 1, 1], [0], [0]>} : vector<6x8x32xf32>, vector<6x8x32xf32>, vector<6x8x8xf32> -> vector<6x8x8xf32>
    "tpu.trace_stop"() : () -> ()
    %cst_6 = arith.constant dense<0xFF800000> : vector<6x8xf32>
    %12 = vector.multi_reduction <maximumf>, %11, %cst_6 [2] : vector<6x8x8xf32> to vector<6x8xf32>
    %13 = vector.shape_cast %12 : vector<6x8xf32> to vector<6x8x1xf32>
    %14 = vector.broadcast %13 : vector<6x8x1xf32> to vector<6x8x8xf32>
    %15 = arith.subf %11, %14 : vector<6x8x8xf32>
    %16 = math.exp %15 : vector<6x8x8xf32>
    %cst_7 = arith.constant dense<0.000000e+00> : vector<6x8xf32>
    %17 = vector.multi_reduction <add>, %16, %cst_7 [2] : vector<6x8x8xf32> to vector<6x8xf32>
    %18 = vector.shape_cast %17 : vector<6x8xf32> to vector<6x8x1xf32>
    %19 = tpu.reciprocal %18 {approx = true} : vector<6x8x1xf32> -> vector<6x8x1xf32>
    %20 = vector.broadcast %19 : vector<6x8x1xf32> to vector<6x8x8xf32>
    %21 = arith.mulf %16, %20 : vector<6x8x8xf32>
    "tpu.trace_start"() <{level = 10 : i32, message = "gqk,gkd->gqd"}> : () -> ()
    %cst_8 = arith.constant dense<0.000000e+00> : vector<6x8x32xf32>
    %22 = tpu.matmul %21, %10, %cst_8 {dimension_numbers = #tpu.dot_dimension_numbers<[2], [1], [1], [2], [0, 0, 0, 1, 1, 2], [0], [0]>} : vector<6x8x8xf32>, vector<6x8x32xf32>, vector<6x8x32xf32> -> vector<6x8x32xf32>
    "tpu.trace_stop"() : () -> ()
    %23 = vector.shape_cast %22 : vector<6x8x32xf32> to vector<2x3x8x32xf32>
    %24 = vector.shape_cast %10 : vector<6x8x32xf32> to vector<2x3x8x32xf32>
    %c0_9 = arith.constant 0 : index
    %c0_10 = arith.constant 0 : index
    %25 = vector.load %arg4[%c0_9, %c0_10] : memref<3x32xf32, #tpu.memory_space<vmem>>, vector<3x32xf32>
    %26 = vector.shape_cast %25 : vector<3x32xf32> to vector<3x1x32xf32>
    %27 = vector.shape_cast %26 : vector<3x1x32xf32> to vector<1x3x1x32xf32>
    %28 = vector.broadcast %27 : vector<1x3x1x32xf32> to vector<2x3x8x32xf32>
    %29 = arith.mulf %28, %23 : vector<2x3x8x32xf32>
    %cst_11 = arith.constant 1.000000e+00 : f32
    %30 = vector.broadcast %cst_11 : f32 to vector<3x1x32xf32>
    %31 = arith.subf %30, %26 : vector<3x1x32xf32>
    %32 = vector.shape_cast %31 : vector<3x1x32xf32> to vector<1x3x1x32xf32>
    %33 = vector.broadcast %32 : vector<1x3x1x32xf32> to vector<2x3x8x32xf32>
    %34 = arith.mulf %33, %24 : vector<2x3x8x32xf32>
    %35 = arith.addf %29, %34 : vector<2x3x8x32xf32>
    %cst_12 = arith.constant dense<0.000000e+00> : vector<2x8x32xf32>
    %36 = vector.multi_reduction <add>, %35, %cst_12 [1] : vector<2x3x8x32xf32> to vector<2x8x32xf32>
    %37 = vector.shape_cast %36 : vector<2x8x32xf32> to vector<16x32xf32>
    %c0_13 = arith.constant 0 : index
    %c0_14 = arith.constant 0 : index
    %38 = vector.load %arg5[%c0_13, %c0_14] : memref<32x32xf32, #tpu.memory_space<vmem>>, vector<32x32xf32>
    %cst_15 = arith.constant dense<0.000000e+00> : vector<16x32xf32>
    %39 = tpu.matmul %37, %38, %cst_15 {dimension_numbers = #tpu.dot_dimension_numbers<[1], [0], [0], [1], [0, 0, 1, 1], [], []>} : vector<16x32xf32>, vector<32x32xf32>, vector<16x32xf32> -> vector<16x32xf32>
    %c0_16 = arith.constant 0 : index
    %c0_17 = arith.constant 0 : index
    %40 = vector.load %arg6[%c0_16, %c0_17] : memref<1x32xf32, #tpu.memory_space<vmem>>, vector<1x32xf32>
    %41 = vector.broadcast %40 : vector<1x32xf32> to vector<16x32xf32>
    %42 = arith.addf %39, %41 : vector<16x32xf32>
    %c0_18 = arith.constant 0 : index
    %c0_19 = arith.constant 0 : index
    %43 = vector.load %arg7[%c0_18, %c0_19] : memref<16x32xf32, #tpu.memory_space<vmem>>, vector<16x32xf32>
    tpu.vector_store %arg7[%c0_18, %c0_19], %42 {strides = array<i32>} : memref<16x32xf32, #tpu.memory_space<vmem>>, vector<16x32xf32>,
    return
  }
  func.func @transform_0(%arg0: i32) -> (i32, i32) {
    %c0_i32 = arith.constant 0 : i32
    %c0_i32_0 = arith.constant 0 : i32
    return %arg0, %c0_i32 : i32, i32
  }
  func.func @transform_1(%arg0: i32) -> (i32, i32) {
    %c0_i32 = arith.constant 0 : i32
    %c0_i32_0 = arith.constant 0 : i32
    %c0_i32_1 = arith.constant 0 : i32
    return %c0_i32, %c0_i32_0 : i32, i32
  }
  func.func @transform_2(%arg0: i32) -> (i32, i32) {
    %c0_i32 = arith.constant 0 : i32
    %c0_i32_0 = arith.constant 0 : i32
    %c0_i32_1 = arith.constant 0 : i32
    return %c0_i32, %c0_i32_0 : i32, i32
  }
  func.func @transform_3(%arg0: i32) -> (i32, i32) {
    %c0_i32 = arith.constant 0 : i32
    %c0_i32_0 = arith.constant 0 : i32
    %c0_i32_1 = arith.constant 0 : i32
    return %c0_i32, %c0_i32_0 : i32, i32
  }
  func.func @transform_4(%arg0: i32) -> (i32, i32) {
    %c0_i32 = arith.constant 0 : i32
    %c0_i32_0 = arith.constant 0 : i32
    %c0_i32_1 = arith.constant 0 : i32
    return %c0_i32, %c0_i32_0 : i32, i32
  }
  func.func @transform_5(%arg0: i32) -> (i32, i32) {
    %c0_i32 = arith.constant 0 : i32
    %c0_i32_0 = arith.constant 0 : i32
    %c0_i32_1 = arith.constant 0 : i32
    return %c0_i32, %c0_i32_0 : i32, i32
  }
  func.func @transform_6(%arg0: i32) -> (i32, i32) {
    %c0_i32 = arith.constant 0 : i32
    %c0_i32_0 = arith.constant 0 : i32
    return %arg0, %c0_i32 : i32, i32
  }
}

</mosaic_0001>

<bundles_post_ra>
// kernel: tpu_custom_call.1
= control target key start
LH: loop header
LB: loop body
LE: loop exit
PB: predicated region body
PF: predicated region fallthrough
CT: control target
= control target key end

     0   :  { %vm41_vm0 = vcmask 261120   ;;  %s1769_s0 = inlined_call_operand.vmem [shape: f32[48,32], index: 0, kind: input, shape index: {}]   ;;  %s1770_s1 = inlined_call_operand.vmem [shape: f32[32,64], index: 1, kind: input, shape index: {}]   ;;  %s1771_s2 = inlined_call_operand.vmem [shape: f32[1,64], index: 2, kind: input, shape index: {}]   ;;  %s1772_s3 = inlined_call_operand.vmem [shape: f32[3,32], index: 3, kind: input, shape index: {}]   ;;  %s1773_s4 = inlined_call_operand.vmem [shape: f32[32,32], index: 4, kind: input, shape index: {}]   ;;  %s1774_s5 = inlined_call_operand.vmem [shape: f32[1,32], index: 5, kind: input, shape index: {}]   ;;  %s1775_s6 = inlined_call_operand.hbm [shape: f32[16,32], index: 6, kind: output, shape index: {}]  }
   0x1   :  { %v30_v0 = vld [vmem:[%s1770_s1] sm:$0xff]  ;;  %v31_v1 = vld [vmem:[%s1770_s1 + $0x8] sm:$0xff]  ;;  %v32_v2 = vld [vmem:[%s1770_s1 + $0x10] sm:$0xff] }
   0x2   :  { %v1481_v3 = vpack.c.bf16 %v31_v1, %v30_v0  ;;  %v33_v4 = vld [vmem:[%s1770_s1 + $0x18] sm:$0xff]  ;;  %v1609_v5 = vld [vmem:[%s1769_s0] sm:$0xff] }
   0x3   :  { %v1485_v6 = vpack.c.bf16 %v33_v4, %v32_v2  ;;  %1401 = vmatprep.mubr.msk.f32.mxu0 %vm41_vm0, %v1609_v5 }
   0x4   :  { %1482 = vmatprep.subr.bf16.mxu0 %v1481_v3 }
   0x5   :  { %11 = vsyncpa [#allocation3], 0  ;;  %1484 = vmatpush3.bf16.msra.mxu0 %v1481_v3  ;;  %v1616_v7 = vld [vmem:[%s1769_s0 + $0x8] sm:$0xff]  ;;  %v1621_v8 = vld [vmem:[%s1769_s0 + $0x10] sm:$0xff]  ;;  %v1552_v12 = vmov 0.0   ;;  %vm1553_vm1 = vmmov 0  }
   0x6   :  { %1486 = vmatprep.subr.bf16.mxu0 %v1485_v6  ;;  %v1630_v9 = vld [vmem:[%s1769_s0 + $0x18] sm:$0xff]  ;;  %v1635_v10 = vld [vmem:[%s1769_s0 + $0x20] sm:$0xff]  ;;  %v1644_v11 = vld [vmem:[%s1769_s0 + $0x28] sm:$0xff]  ;;  %1410 = vmatprep.subr.mxu1 %v1552_v12  ;;  %s1554_s17 = smov 96   ;;  %vm617_vm2 = vcmask 64512   ;;  %s1556_s27 = smov [#allocation2]  }
   0x7   :  { %1412 = vmatprep.mubr.msk.f32.mxu1 %vm1553_vm1, %v1552_v12  ;;  %v1324_v13 = vld [vmem:[%s1771_s2] ss:$0 sm:$0xff]  ;;  %s1313_s28 = sshll.u32 %s1556_s27, 4  ;;  %s1314_s28 = int_to_ptr.vmem [resolvable:$true] %s1313_s28 }
   0x8   :  { %s1528_s29 = scalar_lea.vmem %s1314_s28, 256  ;;  %p1533_p1 = scmp.lt.s32.totalorder %s1314_s28, %s1314_s28 }
   0x9   :  { %1488 = vmatpush3.bf16.msra.mxu0 %v1485_v6  ;;  %p1529_p0 = scmp.ne.s32.totalorder %s1314_s28, %s1528_s29  ;;  %p1534_p2 = scmp.lt.s32.totalorder %s1528_s29, %s1528_s29 }
   0xa   :  { %1440 = vmatprep.subr.mxu0 %v1552_v12 }
   0xb   :  { %p1535_p3 = por %p1534_p2, %p1533_p1 }
   0xc   :  { %1402 = vmatmul.mubr.msk.f32.vlgmr.msra.gmra.mrb[0].mxu0 %vm41_vm0, %v1616_v7 }
   0xd   :  { %1404 = vmatprep.mubr.msk.f32.mxu0 %vm41_vm0, %v1621_v8  ;;  %1441 = vmatpush3.msra.mxu0 %v1609_v5  ;;  %p1536_p4 = pnand %p1535_p3, %p1529_p0 }
   0xe   :  { %1450 = vmatprep.subr.mxu0 %v1552_v12 }
  0x10   :  { %1405 = vmatmul.mubr.msk.f32.gmra.mrb[2].mxu0 %vm41_vm0, %v1630_v9 }
  0x11   :  { %1407 = vmatprep.mubr.msk.f32.mxu0 %vm41_vm0, %v1635_v10 }
  0x14   :  { %1408 = vmatmul.mubr.msk.f32.gmra.mrb[4].mxu0 %vm41_vm0, %v1644_v11 }
  0x15   :  { %1442 = vmatprep.mubr.msk.f32.mxu0 %vm1553_vm1, %v1552_v12 }
  0xdf   :  { %v1403_v14 = vpop.f32.mrb[0].mxu0 }
  0xe0   :  { %v126_v15 = vpop.f32.mrb[1].mxu0  ;;  %v132_v19 = vadd.f32 %v1403_v14, %v1324_v13 }
  0xe1   :  { %v127_v16 = vadd.f32 %v1324_v13, %v126_v15 }
  0xe3   :  { %v1406_v17 = vpop.f32.mrb[2].mxu0  ;;  %156 = vrot.lane.b32.xlu0 %v127_v16, %s1554_s17 }
  0xe4   :  { %v136_v18 = vpop.f32.mrb[3].mxu0  ;;  %v142_v21 = vadd.f32 %v1406_v17, %v1324_v13 }
  0xe5   :  { %v137_v20 = vadd.f32 %v1324_v13, %v136_v18 }
  0xe7   :  { %310 = vrot.lane.b32.xlu1 %v137_v20, %s1554_s17  ;;  %233 = vrot.lane.b32.xlu0 %v132_v19, %s1554_s17  ;;  %v1409_v22 = vpop.f32.mrb[4].mxu0 }
  0xe8   :  { %v146_v23 = vpop.f32.mrb[5].mxu0  ;;  %v152_v25 = vadd.f32 %v1409_v22, %v1324_v13 }
  0xe9   :  { %v147_v24 = vadd.f32 %v1324_v13, %v146_v23 }
  0xeb   :  { %387 = vrot.lane.b32.xlu1 %v142_v21, %s1554_s17  ;;  %464 = vrot.lane.b32.xlu0 %v147_v24, %s1554_s17 }
  0xef   :  { %541 = vrot.lane.b32.xlu1 %v152_v25, %s1554_s17 }
 0x155   :  { %v157_v26 = vpop.permute.xlu0 %156 }
 0x156   :  { %1411 = vmatpush3.xpose.msk.msra.mxu1 %vm41_vm0, %v157_v26 }
 0x157   :  { %1415 = vmatprep.subr.mxu1 %v1552_v12 }
 0x159   :  { %1413 = vmatmul.mubr.msk.f32.vlgmr.msra.gmra.mrb[0].mxu1 %vm41_vm0, %v127_v16  ;;  %v234_v27 = vpop.permute.xlu0 %233  ;;  %v311_v28 = vpop.permute.xlu1 %310 }
 0x15a   :  { %1416 = vmatpush3.xpose.msk.msra.mxu1 %vm41_vm0, %v234_v27  ;;  %1417 = vmatprep.mubr.msk.f32.mxu1 %vm1553_vm1, %v1552_v12 }
 0x15b   :  { %1420 = vmatprep.subr.mxu1 %v1552_v12 }
 0x15d   :  { %1418 = vmatmul.mubr.msk.f32.vlgmr.msra.gmra.mrb[2].mxu1 %vm41_vm0, %v132_v19  ;;  %v388_v29 = vpop.permute.xlu1 %387  ;;  %v465_v30 = vpop.permute.xlu0 %464 }
 0x15e   :  { %1421 = vmatpush3.xpose.msk.msra.mxu1 %vm41_vm0, %v311_v28  ;;  %1422 = vmatprep.mubr.msk.f32.mxu1 %vm1553_vm1, %v1552_v12 }
 0x15f   :  { %1425 = vmatprep.subr.mxu1 %v1552_v12 }
 0x161   :  { %1423 = vmatmul.mubr.msk.f32.vlgmr.msra.gmra.mrb[4].mxu1 %vm41_vm0, %v137_v20  ;;  %v542_v31 = vpop.permute.xlu1 %541 }
 0x162   :  { %1426 = vmatpush3.xpose.msk.msra.mxu1 %vm41_vm0, %v388_v29  ;;  %1427 = vmatprep.mubr.msk.f32.mxu1 %vm1553_vm1, %v1552_v12 }
 0x163   :  { %1430 = vmatprep.subr.mxu1 %v1552_v12 }
 0x165   :  { %1428 = vmatmul.mubr.msk.f32.vlgmr.msra.gmra.mrb[6].mxu1 %vm41_vm0, %v142_v21 }
 0x166   :  { %1431 = vmatpush3.xpose.msk.msra.mxu1 %vm41_vm0, %v465_v30  ;;  %1432 = vmatprep.mubr.msk.f32.mxu1 %vm1553_vm1, %v1552_v12 }
 0x167   :  { %1435 = vmatprep.subr.mxu1 %v1552_v12 }
 0x169   :  { %1433 = vmatmul.mubr.msk.f32.vlgmr.msra.gmra.mrb[8].mxu1 %vm41_vm0, %v147_v24 }
 0x16a   :  { %1436 = vmatpush3.xpose.msk.msra.mxu1 %vm41_vm0, %v542_v31  ;;  %1437 = vmatprep.mubr.msk.f32.mxu1 %vm1553_vm1, %v1552_v12 }
 0x16b   :  { %1445 = vmatprep.subr.mxu1 %v1552_v12 }
 0x16d   :  { %1438 = vmatmul.mubr.msk.f32.vlgmr.msra.gmra.mrb[10].mxu1 %vm41_vm0, %v152_v25 }
 0x16e   :  { %1446 = vmatpush3.msra.mxu1 %v1616_v7  ;;  %1447 = vmatprep.mubr.msk.f32.mxu1 %vm1553_vm1, %v1552_v12 }
 0x16f   :  { %1455 = vmatprep.subr.mxu1 %v1552_v12 }
 0x22c   :  { %v228_v32 = vpop.f32.mrb[0].mxu1 }
 0x22d   :  { %v1414_v33 = vpop.f32.mrb[1].mxu1  ;;  %v618_v34 = vsel %vm617_vm2, %v228_v32, -inf }
 0x22e   :  { %619 = vmax.xlane.f32.xlu0 %v618_v34 }
 0x230   :  { %v305_v35 = vpop.f32.mrb[2].mxu1 }
 0x231   :  { %v1419_v36 = vpop.f32.mrb[3].mxu1  ;;  %v621_v37 = vsel %vm617_vm2, %v305_v35, -inf }
 0x232   :  { %622 = vmax.xlane.f32.xlu1 %v621_v37 }
 0x234   :  { %v382_v38 = vpop.f32.mrb[4].mxu1 }
 0x235   :  { %v1424_v39 = vpop.f32.mrb[5].mxu1  ;;  %v624_v40 = vsel %vm617_vm2, %v382_v38, -inf }
 0x236   :  { %625 = vmax.xlane.f32.xlu0 %v624_v40 }
 0x238   :  { %v459_v41 = vpop.f32.mrb[6].mxu1 }
 0x239   :  { %v1429_v42 = vpop.f32.mrb[7].mxu1  ;;  %v627_v43 = vsel %vm617_vm2, %v459_v41, -inf }
 0x23a   :  { %628 = vmax.xlane.f32.xlu0 %v627_v43  ;;  %v1215_v42 = vld [vmem:[%s1773_s4 + $0x8] sm:$0xff] }
 0x23c   :  { %v536_v44 = vpop.f32.mrb[8].mxu1 }
 0x23d   :  { %v1434_v45 = vpop.f32.mrb[9].mxu1  ;;  %v630_v46 = vsel %vm617_vm2, %v536_v44, -inf }
 0x23e   :  { %631 = vmax.xlane.f32.xlu1 %v630_v46  ;;  %v1555_v46 = vmov 1966171168  }
 0x240   :  { %v613_v47 = vpop.f32.mrb[10].mxu1 }
 0x241   :  { %v1439_v48 = vpop.f32.mrb[11].mxu1  ;;  %v633_v49 = vsel %vm617_vm2, %v613_v47, -inf }
 0x242   :  { %634 = vmax.xlane.f32.xlu0 %v633_v49  ;;  %v1135_v48 = vlaneseq }
 0x2bb   :  { %v620_v50 = vpop.xlane.xlu0 %619 }
 0x2bc   :  { %v636_v51 = vsub.f32 %v228_v32, %v620_v50  ;;  %v1136_v50 = vshrl.u32 %v1135_v48, 7 }
 0x2be   :  { %v642_v52 = vmul.f32 1.442695, %v636_v51 }
 0x2bf   :  { %v623_v53 = vpop.xlane.xlu1 %622 }
 0x2c0   :  { %1504 = vpow2.f32 %v642_v52  ;;  %v637_v54 = vsub.f32 %v305_v35, %v623_v53  ;;  %v1349_v52 = vld.sshfl [vmem:[%s1772_s3] sm:$0x13 pattern:$0x75316420] }
 0x2c1   :  { %v1131_v53 = vcombine.high %v1349_v52, %v1349_v52 }
 0x2c2   :  { %v644_v55 = vmul.f32 1.442695, %v637_v54 }
 0x2c3   :  { %v626_v56 = vpop.xlane.xlu0 %625 }
 0x2c4   :  { %1506 = vpow2.f32 %v644_v55  ;;  %v638_v57 = vsub.f32 %v382_v38, %v626_v56  ;;  %v1152_v56 = vsub.s32 0, %v1136_v50 }
 0x2c6   :  { %v646_v58 = vmul.f32 1.442695, %v638_v57 }
 0x2c7   :  { %v629_v59 = vpop.xlane.xlu0 %628 }
 0x2c8   :  { %1508 = vpow2.f32 %v646_v58  ;;  %v639_v60 = vsub.f32 %v459_v41, %v629_v59  ;;  %v1214_v41 = vld [vmem:[%s1773_s4] sm:$0xff] }
 0x2c9   :  { %v1489_v43 = vpack.c.bf16 %v1215_v42, %v1214_v41 }
 0x2ca   :  { %v1505_v61 = vpop.eup %1504  ;;  %v648_v62 = vmul.f32 1.442695, %v639_v60 }
 0x2cb   :  { %v632_v63 = vpop.xlane.xlu1 %631  ;;  %v654_v0 = vsel %vm617_vm2, %v1505_v61, 0.0 }
 0x2cc   :  { %1510 = vpow2.f32 %v648_v62  ;;  %v640_v1 = vsub.f32 %v536_v44, %v632_v63  ;;  %655 = vadd.xlane.f32.xlu1 %v654_v0  ;;  %v1217_v44 = vld [vmem:[%s1773_s4 + $0x18] sm:$0xff] }
 0x2ce   :  { %v1507_v2 = vpop.eup %1506  ;;  %v650_v3 = vmul.f32 1.442695, %v640_v1 }
 0x2cf   :  { %v635_v4 = vpop.xlane.xlu0 %634  ;;  %v657_v6 = vsel %vm617_vm2, %v1507_v2, 0.0 }
 0x2d0   :  { %1512 = vpow2.f32 %v650_v3  ;;  %v641_v13 = vsub.f32 %v613_v47, %v635_v4  ;;  %658 = vadd.xlane.f32.xlu0 %v657_v6  ;;  %v1133_v47 = vunpack.c.l.s4 %v1555_v46 }
 0x2d2   :  { %v1509_v14 = vpop.eup %1508  ;;  %v652_v15 = vmul.f32 1.442695, %v641_v13  ;;  %v1134_v49 = vunpack.c.0.s8 %v1133_v47 }
 0x2d3   :  { %v660_v16 = vsel %vm617_vm2, %v1509_v14, 0.0 }
 0x2d4   :  { %1514 = vpow2.f32 %v652_v15  ;;  %661 = vadd.xlane.f32.xlu1 %v660_v16  ;;  %v1137_v51 = vsub.s32 %v1134_v49, %v1136_v50 }
 0x2d6   :  { %v1511_v17 = vpop.eup %1510  ;;  %v1138_v54 = vrot.slane %v1349_v52, %v1137_v51  ;;  %v1145_v55 = vrot.slane %v1131_v53, %v1137_v51 }
 0x2d7   :  { %v663_v18 = vsel %vm617_vm2, %v1511_v17, 0.0 }
 0x2d8   :  { %664 = vadd.xlane.f32.xlu0 %v663_v18  ;;  %v1171_v57 = vsub.f32 1.0, %v1138_v54  ;;  %v1172_v58 = vsub.f32 1.0, %v1145_v55  ;;  %v1146_v59 = vcombine.high %v1138_v54, %v1138_v54  ;;  %v1157_v4 = vrot.slane %v1145_v55, %v1152_v56 }
 0x2da   :  { %v1513_v19 = vpop.eup %1512  ;;  %v1180_v60 = vrot.slane %v1171_v57, %v1152_v56  ;;  %v1184_v62 = vrot.slane %v1172_v58, %v1152_v56  ;;  %v1173_v63 = vsub.f32 1.0, %v1146_v59  ;;  %v1161_v18 = vrot.slane %v1146_v59, %v1152_v56 }
 0x2db   :  { %v666_v20 = vsel %vm617_vm2, %v1513_v19, 0.0 }
 0x2dc   :  { %667 = vadd.xlane.f32.xlu1 %v666_v20  ;;  %v1192_v1 = vmul.f32 %v1180_v60, %v1609_v5  ;;  %v1193_v6 = vmul.f32 %v1184_v62, %v1616_v7  ;;  %v1188_v13 = vrot.slane %v1173_v63, %v1152_v56 }
 0x2de   :  { %v1515_v21 = vpop.eup %1514  ;;  %v1194_v20 = vmul.f32 %v1188_v13, %v1621_v8 }
 0x2df   :  { %v669_v22 = vsel %vm617_vm2, %v1515_v21, 0.0 }
 0x2e0   :  { %670 = vadd.xlane.f32.xlu0 %v669_v22 }
 0x359   :  { %v656_v23 = vpop.xlane.xlu1 %655 }
 0x35a   :  { %1516 = vrcp.f32 %v656_v23 }
 0x35d   :  { %v659_v24 = vpop.xlane.xlu0 %658 }
 0x35e   :  { %1518 = vrcp.f32 %v659_v24 }
 0x361   :  { %v662_v25 = vpop.xlane.xlu1 %661 }
 0x362   :  { %1520 = vrcp.f32 %v662_v25 }
 0x364   :  { %v1517_v26 = vpop.eup %1516 }
 0x365   :  { %v678_v27 = vmul.f32 %v1517_v26, %v1505_v61  ;;  %v665_v28 = vpop.xlane.xlu0 %664  ;;  %v1153_v61 = vrot.slane %v1138_v54, %v1152_v56 }
 0x366   :  { %1522 = vrcp.f32 %v665_v28 }
 0x367   :  { %1443 = vmatmul.mubr.msk.f32.vlgmr.msra.gmra.mrb[6].mxu0 %vm617_vm2, %v678_v27 }
 0x368   :  { %v1519_v29 = vpop.eup %1518  ;;  %1451 = vmatpush3.msra.mxu0 %v1621_v8  ;;  %1452 = vmatprep.mubr.msk.f32.mxu0 %vm1553_vm1, %v1552_v12 }
 0x369   :  { %v679_v30 = vmul.f32 %v1519_v29, %v1507_v2  ;;  %v668_v31 = vpop.xlane.xlu1 %667  ;;  %1460 = vmatprep.subr.mxu0 %v1552_v12  ;;  %v1195_v29 = vmul.f32 %v1180_v60, %v1630_v9 }
 0x36a   :  { %1524 = vrcp.f32 %v668_v31 }
 0x36b   :  { %1448 = vmatmul.mubr.msk.f32.vlgmr.msra.gmra.mrb[12].mxu1 %vm617_vm2, %v679_v30 }
 0x36c   :  { %v1521_v32 = vpop.eup %1520  ;;  %1456 = vmatpush3.msra.mxu1 %v1630_v9  ;;  %1457 = vmatprep.mubr.msk.f32.mxu1 %vm1553_vm1, %v1552_v12 }
 0x36d   :  { %v680_v33 = vmul.f32 %v1521_v32, %v1509_v14  ;;  %v671_v34 = vpop.xlane.xlu0 %670  ;;  %1465 = vmatprep.subr.mxu1 %v1552_v12  ;;  %v1196_v32 = vmul.f32 %v1184_v62, %v1635_v10 }
 0x36e   :  { %1526 = vrcp.f32 %v671_v34 }
 0x36f   :  { %1453 = vmatmul.mubr.msk.f32.vlgmr.msra.gmra.mrb[8].mxu0 %vm617_vm2, %v680_v33 }
 0x370   :  { %v1523_v35 = vpop.eup %1522  ;;  %1461 = vmatpush3.msra.mxu0 %v1635_v10  ;;  %1462 = vmatprep.mubr.msk.f32.mxu0 %vm1553_vm1, %v1552_v12 }
 0x371   :  { %v681_v36 = vmul.f32 %v1523_v35, %v1511_v17  ;;  %1490 = vmatprep.subr.bf16.mxu0 %v1489_v43 }
 0x373   :  { %1458 = vmatmul.mubr.msk.f32.vlgmr.msra.gmra.mrb[14].mxu1 %vm617_vm2, %v681_v36 }
 0x374   :  { %v1525_v37 = vpop.eup %1524  ;;  %1466 = vmatpush3.msra.mxu1 %v1644_v11  ;;  %1467 = vmatprep.mubr.msk.f32.mxu1 %vm1553_vm1, %v1552_v12  ;;  %v1216_v12 = vld [vmem:[%s1773_s4 + $0x10] sm:$0xff] }
 0x375   :  { %v682_v38 = vmul.f32 %v1525_v37, %v1513_v19  ;;  %v1493_v45 = vpack.c.bf16 %v1217_v44, %v1216_v12  ;;  %v1197_v37 = vmul.f32 %v1188_v13, %v1644_v11  ;;  %v1350_v44 = vld [vmem:[%s1774_s5] ss:$0 sm:$0xff] }
 0x377   :  { %1463 = vmatmul.mubr.msk.f32.vlgmr.msra.gmra.mrb[10].mxu0 %vm617_vm2, %v682_v38 }
 0x378   :  { %v1527_v39 = vpop.eup %1526  ;;  %1492 = vmatpush3.bf16.msra.mxu0 %v1489_v43 }
 0x379   :  { %v683_v40 = vmul.f32 %v1527_v39, %v1515_v21  ;;  %1494 = vmatprep.subr.bf16.mxu0 %v1493_v45 }
 0x37b   :  { %1468 = vmatmul.mubr.msk.f32.vlgmr.msra.gmra.mrb[16].mxu1 %vm617_vm2, %v683_v40 }
 0x37c   :  { %1496 = vmatpush3.bf16.msra.mxu0 %v1493_v45 }
 0x43a   :  { %v753_v0 = vpop.f32.mrb[6].mxu0 }
 0x43b   :  { %v1165_v2 = vmul.f32 %v1153_v61, %v753_v0  ;;  %v1444_v3 = vpop.f32.mrb[7].mxu0 }
 0x43d   :  { %v1198_v15 = vadd.f32 %v1192_v1, %v1165_v2 }
 0x43e   :  { %v826_v14 = vpop.f32.mrb[12].mxu1 }
 0x43f   :  { %v1166_v16 = vmul.f32 %v1157_v4, %v826_v14  ;;  %v1449_v17 = vpop.f32.mrb[13].mxu1  ;;  %v1204_v22 = vsel %vm41_vm0, %v1198_v15, 0.0 }
 0x441   :  { %v1199_v19 = vadd.f32 %v1193_v6, %v1166_v16 }
 0x442   :  { %v899_v21 = vpop.f32.mrb[8].mxu0 }
 0x443   :  { %v1205_v23 = vsel %vm41_vm0, %v1199_v19, 0.0  ;;  %v1167_v5 = vmul.f32 %v1161_v18, %v899_v21  ;;  %v1454_v24 = vpop.f32.mrb[9].mxu0 }
 0x444   :  { %v1206_v25 = vadd.f32 %v1205_v23, %v1204_v22 }
 0x445   :  { %v1200_v26 = vadd.f32 %v1194_v20, %v1167_v5 }
 0x446   :  { %v972_v27 = vpop.f32.mrb[14].mxu1 }
 0x447   :  { %v1207_v7 = vsel %vm41_vm0, %v1200_v26, 0.0  ;;  %v1168_v28 = vmul.f32 %v1153_v61, %v972_v27  ;;  %v1459_v30 = vpop.f32.mrb[15].mxu1 }
 0x448   :  { %v1208_v31 = vadd.f32 %v1207_v7, %v1206_v25 }
 0x449   :  { %v1201_v33 = vadd.f32 %v1195_v29, %v1168_v28 }
 0x44a   :  { %v1045_v8 = vpop.f32.mrb[10].mxu0  ;;  %1478 = vmatprep.mubr.msk.f32.mxu0 %vm41_vm0, %v1208_v31 }
 0x44b   :  { %v1169_v34 = vmul.f32 %v1157_v4, %v1045_v8  ;;  %v1464_v35 = vpop.f32.mrb[11].mxu0  ;;  %v1209_v39 = vsel %vm41_vm0, %v1201_v33, 0.0 }
 0x44d   :  { %v1202_v36 = vadd.f32 %v1196_v32, %v1169_v34 }
 0x44e   :  { %v1118_v38 = vpop.f32.mrb[16].mxu1 }
 0x44f   :  { %v1210_v40 = vsel %vm41_vm0, %v1202_v36, 0.0  ;;  %v1170_v41 = vmul.f32 %v1161_v18, %v1118_v38  ;;  %v1469_v9 = vpop.f32.mrb[17].mxu1 }
 0x450   :  { %v1211_v42 = vadd.f32 %v1210_v40, %v1209_v39 }
 0x451   :  { %v1203_v43 = vadd.f32 %v1197_v37, %v1170_v41 }
 0x453   :  { %v1212_v10 = vsel %vm41_vm0, %v1203_v43, 0.0 }
 0x454   :  { %v1213_v12 = vadd.f32 %v1212_v10, %v1211_v42 }
 0x456   :  { %1479 = vmatmul.mubr.msk.f32.vlgmr.msra.gmra.mrb[12].mxu0 %vm41_vm0, %v1213_v12 }
 0x529   :  { %v1480_v11 = vpop.f32.mrb[12].mxu0 }
 0x52a   :  { %v1303_v45 = vadd.f32 %v1480_v11, %v1350_v44  ;;  %v1297_v46 = vpop.f32.mrb[13].mxu0 }
 0x52b   :  { %v1298_v47 = vadd.f32 %v1350_v44, %v1297_v46 }
 0x52c   :  { %1307 = vst.msk [vmem:[#allocation2 + $0x8] sm:$0xff] %vm41_vm0, %v1303_v45 }
 0x52d   :  { %1306 = vst.msk [vmem:[#allocation2] sm:$0xff] %vm41_vm0, %v1298_v47 }
 0x52e   :  { %1539 = shalt.err (!%p1536_p4)
}
 0x52f   :  { %s1540_s7 = scalar_lea.hbm %s1775_s6, 256 }
 0x530   :  { %p1541_p5 = scmp.ne.s32.totalorder %s1775_s6, %s1540_s7  ;;  %p1544_p6 = scmp.lt.u32.totalorder %s1540_s7, %s1775_s6 }
 0x532   :  { %p1546_p7 = pnand %p1544_p6, %p1541_p5 }
 0x534   :  { %1549 = shalt.err (!%p1546_p7)
}
 0x535   :  { %s1557_s11 = smov 128   ;;  %s1558_s12 = smov 8  }
 0x536   :  { %1319 = dma.vmem_to_hbm [thread:$0]  %s1314_s28, 256, %s1775_s6, [#allocation3], %s1557_s11, %s1557_s11, %s1558_s12  }
 0x537   :  { %1550 = dma.done.wait [#allocation3], 256  }
 0x538   :  { %1551 = vsyncadd [#allocation3], 4294967040 }
 0x539   :  { %1323 = vsyncpa [#allocation3], 1 }

</bundles_post_ra>
